<compile_context>
chip_gen: v6e
topology: v6e:2x2x1
jax: 0.10.0
libtpu: 0.0.40
codegen_flags: <defaults>
</compile_context>

<pallas_src>
import functools

import jax
import jax.numpy as jnp
from jax.experimental import pallas as pl
from jax.experimental.pallas import tpu as pltpu


def _round_up(v, m):
    return ((v + m - 1) // m) * m


def _smoothness_kernel(x_ref, o_ref, *, diff_shift, n_chunks, tail_rows, scale):
    i = pl.program_id(0)          # reduction axis over row-chunks ("arbitrary")

    @pl.when(i == 0)
    def _():
        o_ref[...] = jnp.zeros_like(o_ref)

    x = x_ref[...].astype(jnp.float32)             # (rows_per_block, L)
    shifted = pltpu.roll(x, diff_shift, axis=1)    # shifted[:, j] = x[:, j - D]
    diff = shifted - x                             # valid only for lanes j >= D
    lane_ok = jax.lax.broadcasted_iota(jnp.int32, x.shape, 1) >= diff_shift

    def accumulate(valid):
        # Select (not multiply): Pallas-padded tail rows may contain NaN garbage.
        d = jnp.where(valid, diff, 0.0)
        o_ref[...] += jnp.sum(d * d).reshape(1, 1)

    if tail_rows is None:
        # rows % rpb == 0: no padded rows anywhere -> lane mask only.
        accumulate(lane_ok)
    else:
        @pl.when(i < n_chunks - 1)
        def _():                                   # interior blocks: cheap path
            accumulate(lane_ok)

        @pl.when(i == n_chunks - 1)
        def _():                                   # only the last block has padded rows
            row_ok = jax.lax.broadcasted_iota(jnp.int32, x.shape, 0) < tail_rows
            accumulate(jnp.logical_and(lane_ok, row_ok))

    @pl.when(i == n_chunks - 1)
    def _():
        o_ref[...] *= scale


def smoothness_loss(predictions, alpha=10.0, *, block_bytes=8 * 1024 * 1024):
    if predictions.ndim < 3:
        raise ValueError("The input tensor must be 3-dimensional.")

    b = predictions.shape[0]
    ch = predictions.shape[1]
    s = predictions.shape[2]
    feat = 1
    for t in predictions.shape[3:]:
        feat *= t

    if s < 2 or b == 0 or ch == 0 or feat == 0:
        return jnp.zeros((), jnp.float32)          # empty diff -> zero loss

    rows = b * ch
    lanes = s * feat
    x = predictions.reshape(rows, lanes)           # free, row-major, lane-dense
    scale = float(alpha) / float(b)

    itemsize = jnp.dtype(x.dtype).itemsize
    bytes_per_row = lanes * itemsize
    rpb = max(1, block_bytes // bytes_per_row)
    rpb = max(8, (rpb // 8) * 8)                   # sublane-aligned block height
    rpb = min(rpb, _round_up(rows, 8))             # don't exceed (padded) rows
    # TODO(synk): if a single 8-row block (8 * S * feat elems) ever exceeds VMEM,
    # tile the lane axis at multiples of feat as well.

    n_chunks = pl.cdiv(rows, rpb)
    tail_rows = None if rows % rpb == 0 else rows - (n_chunks - 1) * rpb

    kernel = functools.partial(
        _smoothness_kernel,
        diff_shift=feat, n_chunks=n_chunks, tail_rows=tail_rows, scale=scale)

    grid_spec = pltpu.PrefetchScalarGridSpec(
        num_scalar_prefetch=0,
        grid=(n_chunks,),
        in_specs=[pl.BlockSpec((rpb, lanes), lambda i: (i, 0))],
        out_specs=pl.BlockSpec((1, 1), lambda i: (0, 0)),
    )

    out = pl.pallas_call(
        kernel,
        out_shape=jax.ShapeDtypeStruct((1, 1), jnp.float32),
        grid_spec=grid_spec,
        compiler_params=pltpu.CompilerParams(
            dimension_semantics=("arbitrary",),
            vmem_limit_bytes=32 * 1024 * 1024),    # 2 x 8 MiB input buffers fit easily
        cost_estimate=pl.CostEstimate(
            flops=3 * x.size, transcendentals=0,
            bytes_accessed=x.size * itemsize + 4),
    )(x)
    return out[0, 0]


if __name__ == "__main__":
    alpha = 10.0

    # Test 1: 4-D float32 input (B, C, S, D), single block.
    key = jax.random.PRNGKey(0)
    B, C, S, D = 2, 4, 16, 16
    preds = jax.random.normal(key, (B, C, S, D), dtype=jnp.float32)
    loss = jax.block_until_ready(smoothness_loss(preds, alpha=alpha))
    diffs = preds[:, :, 1:] - preds[:, :, :-1]
    ref = alpha * jnp.sum(diffs ** 2) / B
    assert jnp.allclose(loss, ref, rtol=1e-4, atol=1e-5), (loss, ref)

    # Test 2: 3-D bf16 input, forced multi-chunk grid + padded tail block.
    key2 = jax.random.PRNGKey(0)
    B2, C2, S2 = 3, 5, 40
    preds3 = jax.random.normal(
        key2, (B2, C2, S2), dtype=jnp.float32).astype(jnp.bfloat16)
    loss2 = jax.block_until_ready(
        smoothness_loss(preds3, alpha=alpha, block_bytes=640))
    p32 = preds3.astype(jnp.float32)
    diffs2 = p32[:, :, 1:] - p32[:, :, :-1]
    ref2 = alpha * jnp.sum(diffs2 ** 2) / B2
    assert jnp.allclose(loss2, ref2, rtol=1e-4, atol=1e-4), (loss2, ref2)

    print("KERNEL_OK")
</pallas_src>

<mosaic_0001>
module attributes {stable_mosaic.version = 11 : i64} {
  func.func @_smoothness_kernel(%arg0: i32, %arg1: memref<8x256xf32, #tpu.memory_space<vmem>>, %arg2: memref<1x1xf32, #tpu.memory_space<vmem>>) attributes {dimension_semantics = [#tpu.dimension_semantics<arbitrary>], iteration_bounds = array<i64: 1>, scalar_prefetch = 0 : i64, scratch_operands = 0 : i64, tpu.core_type = #tpu.core_type<tc>, window_params = [{transform_indices = @transform_0, window_bounds = array<i64: 8, 256>}, {pipeline_mode = #tpu.pipeline_mode<synchronous>, transform_indices = @transform_1, window_bounds = array<i64: 1, 1>}]} {
    %c0_i32 = arith.constant 0 : i32
    %0 = arith.cmpi eq, %arg0, %c0_i32 : i32
    %1 = arith.extui %0 : i1 to i32
    %c0_i32_0 = arith.constant 0 : i32
    %2 = arith.cmpi ne, %1, %c0_i32_0 : i32
    scf.if %2 {
      %cst_10 = arith.constant 0.000000e+00 : f32
      %23 = vector.broadcast %cst_10 : f32 to vector<1x1xf32>
      %c0_11 = arith.constant 0 : index
      %c0_12 = arith.constant 0 : index
      %24 = vector.load %arg2[%c0_11, %c0_12] : memref<1x1xf32, #tpu.memory_space<vmem>>, vector<1x1xf32>
      tpu.vector_store %arg2[%c0_11, %c0_12], %23 {strides = array<i32>} : memref<1x1xf32, #tpu.memory_space<vmem>>, vector<1x1xf32>,
    } else {
    }
    %c0 = arith.constant 0 : index
    %c0_1 = arith.constant 0 : index
    %3 = vector.load %arg1[%c0, %c0_1] : memref<8x256xf32, #tpu.memory_space<vmem>>, vector<8x256xf32>
    %c16_i32 = arith.constant 16 : i32
    %4 = tpu.dynamic_rotate %3 by %c16_i32 dim 1 : vector<8x256xf32>, i32 -> vector<8x256xf32>
    %5 = arith.subf %4, %3 : vector<8x256xf32>
    %6 = tpu.iota {dimensions = array<i32: 1>} : vector<8x256xi32>
    %c16_i32_2 = arith.constant 16 : i32
    %7 = vector.broadcast %c16_i32_2 : i32 to vector<8x256xi32>
    %8 = arith.cmpi sge, %6, %7 : vector<8x256xi32>
    %cst = arith.constant 0.000000e+00 : f32
    %9 = vector.broadcast %cst : f32 to vector<8x256xf32>
    %10 = arith.select %8, %5, %9 : vector<8x256xi1>, vector<8x256xf32>
    %c0_3 = arith.constant 0 : index
    %c0_4 = arith.constant 0 : index
    %11 = vector.load %arg2[%c0_3, %c0_4] : memref<1x1xf32, #tpu.memory_space<vmem>>, vector<1x1xf32>
    %12 = arith.mulf %10, %10 : vector<8x256xf32>
    %13 = vector.shape_cast %12 : vector<8x256xf32> to vector<1x8x256xf32>
    %cst_5 = arith.constant dense<0.000000e+00> : vector<1xf32>
    %14 = vector.multi_reduction <add>, %13, %cst_5 [1, 2] : vector<1x8x256xf32> to vector<1xf32>
    %15 = vector.shape_cast %14 : vector<1xf32> to vector<1x1x1xf32>
    %16 = vector.extract %15[0, 0, 0] : f32 from vector<1x1x1xf32>
    %17 = vector.broadcast %16 : f32 to vector<1x1xf32>
    %18 = arith.addf %11, %17 : vector<1x1xf32>
    %c0_6 = arith.constant 0 : index
    %c0_7 = arith.constant 0 : index
    %19 = vector.load %arg2[%c0_6, %c0_7] : memref<1x1xf32, #tpu.memory_space<vmem>>, vector<1x1xf32>
    tpu.vector_store %arg2[%c0_6, %c0_7], %18 {strides = array<i32>} : memref<1x1xf32, #tpu.memory_space<vmem>>, vector<1x1xf32>,
    %c0_i32_8 = arith.constant 0 : i32
    %20 = arith.cmpi eq, %arg0, %c0_i32_8 : i32
    %21 = arith.extui %20 : i1 to i32
    %c0_i32_9 = arith.constant 0 : i32
    %22 = arith.cmpi ne, %21, %c0_i32_9 : i32
    scf.if %22 {
      %c0_10 = arith.constant 0 : index
      %c0_11 = arith.constant 0 : index
      %23 = vector.load %arg2[%c0_10, %c0_11] : memref<1x1xf32, #tpu.memory_space<vmem>>, vector<1x1xf32>
      %cst_12 = arith.constant 5.000000e+00 : f32
      %24 = vector.broadcast %cst_12 : f32 to vector<1x1xf32>
      %25 = arith.mulf %23, %24 : vector<1x1xf32>
      %c0_13 = arith.constant 0 : index
      %c0_14 = arith.constant 0 : index
      %26 = vector.load %arg2[%c0_13, %c0_14] : memref<1x1xf32, #tpu.memory_space<vmem>>, vector<1x1xf32>
      tpu.vector_store %arg2[%c0_13, %c0_14], %25 {strides = array<i32>} : memref<1x1xf32, #tpu.memory_space<vmem>>, vector<1x1xf32>,
    } else {
    }
    return
  }
  func.func @transform_0(%arg0: i32) -> (i32, i32) {
    %c0_i32 = arith.constant 0 : i32
    %c0_i32_0 = arith.constant 0 : i32
    return %arg0, %c0_i32 : i32, i32
  }
  func.func @transform_1(%arg0: i32) -> (i32, i32) {
    %c0_i32 = arith.constant 0 : i32
    %c0_i32_0 = arith.constant 0 : i32
    %c0_i32_1 = arith.constant 0 : i32
    return %c0_i32, %c0_i32_0 : i32, i32
  }
}

</mosaic_0001>

<bundles_post_ra>
// kernel: tpu_custom_call.1
= control target key start
LH: loop header
LB: loop body
LE: loop exit
PB: predicated region body
PF: predicated region fallthrough
CT: control target
= control target key end

     0   :  { %6 = vsyncpa [#allocation3], 0  ;;  %s156_s0 = inlined_call_operand.hbm [shape: f32[8,256], index: 0, kind: input, shape index: {}]   ;;  %s157_s1 = inlined_call_operand.hbm [shape: f32[1,1], index: 1, kind: output, shape index: {}]  }
   0x1   :  { %7 = vsyncpa [#allocation4], 0  ;;  %s133_s6 = smov [#allocation2]  }
   0x2   :  { %s14_s7 = sshll.u32 %s133_s6, 4  ;;  %s15_s7 = int_to_ptr.vmem [resolvable:$true] %s14_s7 }
   0x3   :  { %s97_s8 = scalar_lea.vmem %s15_s7, 256  ;;  %p102_p1 = scmp.lt.s32.totalorder %s15_s7, %s15_s7 }
   0x4   :  { %p98_p0 = scmp.ne.s32.totalorder %s15_s7, %s97_s8  ;;  %p103_p2 = scmp.lt.s32.totalorder %s97_s8, %s97_s8 }
   0x6   :  { %p104_p3 = por %p103_p2, %p102_p1 }
   0x8   :  { %p105_p4 = pnand %p104_p3, %p98_p0 }
   0xa   :  { %108 = shalt.err (!%p105_p4)
}
   0xb   :  { %17 = dma.hbm_to_vmem [thread:$0]  %s156_s0, 256, %s15_s7, [#allocation3]  }
   0xc   :  { %129 = dma.done.wait [#allocation3], 256  }
   0xd   :  { %130 = vsyncadd [#allocation3], 4294967040  ;;  %v27_v0 = vld [vmem:[#allocation2] sm:$0xff]  ;;  %s134_s11 = smov 16   ;;  %v28_v1 = vld [vmem:[#allocation2 + $0x8] sm:$0xff]  ;;  %v33_v2 = vlaneseq  ;;  %vm25_vm2 = vcmask 0  }
   0xe   :  { %29 = vrot.lane.b32.xlu0 %v27_v0, %s134_s11  ;;  %v135_v14 = vmov 0.0   ;;  %s136_s12 = smov [#allocation5]  }
   0xf   :  { %v34_v3 = vand.u32 127, %v33_v2  ;;  %26 = vst.msk [vmem:[#allocation5] sm:$0x1] %vm25_vm2, %v135_v14  ;;  %s74_s13 = sshll.u32 %s136_s12, 4  ;;  %s75_s13 = int_to_ptr.vmem [resolvable:$true] %s74_s13 }
  0x10   :  { %s109_s14 = scalar_lea.vmem %s75_s13, 16  ;;  %s113_s15 = scalar_lea.vmem %s75_s13, 32 }
  0x11   :  { %vm35_vm0 = vcmp.lt.s32.totalorder %v34_v3, 16  ;;  %vm41_vm1 = vcmp.ge.s32.totalorder %v34_v3, 16  ;;  %p110_p5 = scmp.ne.s32.totalorder %s75_s13, %s109_s14  ;;  %p114_p6 = scmp.lt.s32.totalorder %s75_s13, %s75_s13 }
  0x12   :  { %31 = vrot.lane.b32.xlu0 %v28_v1, %s134_s11  ;;  %p115_p7 = scmp.lt.s32.totalorder %s113_s15, %s109_s14 }
  0x14   :  { %p116_p8 = por %p115_p7, %p114_p6 }
  0x16   :  { %v45_v22 = vld [vmem:[#allocation5] sm:$0x1]  ;;  %p117_p9 = pnand %p116_p8, %p110_p5 }
  0x80   :  { %v30_v4 = vpop.permute.xlu0 %29 }
  0x84   :  { %v32_v5 = vpop.permute.xlu0 %31 }
  0x85   :  { %v36_v6 = vsel %vm35_vm0, %v30_v4, %v32_v5  ;;  %v37_v7 = vsel %vm35_vm0, %v32_v5, %v30_v4 }
  0x86   :  { %v38_v8 = vsub.f32 %v37_v7, %v27_v0  ;;  %v39_v9 = vsub.f32 %v36_v6, %v28_v1 }
  0x88   :  { %v43_v10 = vsel %vm41_vm1, %v38_v8, 0.0  ;;  %v47_v11 = vmul.f32 %v39_v9, %v39_v9 }
  0x89   :  { %v46_v12 = vmul.f32 %v43_v10, %v43_v10 }
  0x8b   :  { %v48_v13 = vadd.f32 %v47_v11, %v46_v12 }
  0x8d   :  { %49 = vadd.xlane.f32.xlu1 %v48_v13 }
 0x116   :  { %v50_v15 = vpop.xlane.xlu1 %49 }
 0x117   :  { %v51_v16 = vrot.slane %v50_v15, 4 }
 0x119   :  { %v52_v17 = vadd.f32 %v51_v16, %v50_v15 }
 0x11b   :  { %v53_v18 = vrot.slane %v52_v17, 2 }
 0x11d   :  { %v54_v19 = vadd.f32 %v53_v18, %v52_v17 }
 0x11f   :  { %v55_v20 = vrot.slane %v54_v19, 1 }
 0x121   :  { %v56_v21 = vadd.f32 %v55_v20, %v54_v19 }
 0x123   :  { %83 = vpush %v56_v21 }
 0x154   :  { %s84_s0 = spop %83 }
 0x155   :  { %v58_v23 = vstv %s84_s0 }
 0x156   :  { %v59_v24 = vadd.f32 %v58_v23, %v45_v22 }
 0x158   :  { %61 = vst.msk [vmem:[#allocation5] sm:$0x1] %vm25_vm2, %v59_v24 }
 0x15f   :  { %v65_v25 = vld [vmem:[#allocation5] sm:$0x1] }
 0x160   :  { %v66_v26 = vmul.f32 5.0, %v65_v25 }
 0x162   :  { %67 = vst.msk [vmem:[#allocation5] sm:$0x1] %vm25_vm2, %v66_v26 }
 0x163   :  { %120 = shalt.err (!%p117_p9)
}
 0x164   :  { %77 = dma.vmem_to_hbm [thread:$0]  %s75_s13, 16, %s157_s1, [#allocation4]  }
 0x165   :  { %131 = dma.done.wait [#allocation4], 16  }
 0x166   :  { %132 = vsyncadd [#allocation4], 4294967280 }
 0x167   :  { %81 = vsyncpa [#allocation3], 1 }
 0x168   :  { %82 = vsyncpa [#allocation4], 1 }

</bundles_post_ra>
